<compile_context>
chip_gen: v6e
topology: v6e:2x2x1
jax: 0.10.0
libtpu: 0.0.40
codegen_flags: <defaults>
</compile_context>

<pallas_src>
import functools

import numpy as np
import jax
import jax.numpy as jnp
from jax.experimental import pallas as pl
from jax.experimental.pallas import tpu as pltpu


B_PAD = 8      # sublane-aligned batch tile
D_PAD = 128    # lane-aligned feature width (covers all layer widths: 16/32/32/8)


# ---------------------------------------------------------------------------
# Kernel: fused layer chain.  Two operands only.
#   x_ref   : (B_PAD, D_PAD)          padded input
#   w_ref   : (L, D_PAD + 8, D_PAD)   packed slab; [:, :128, :] = W^T, [:, 128, :] = bias
#   out_ref : (B_PAD, D_PAD)          lane-dense padded output
# ---------------------------------------------------------------------------
def mlp_tanh_kernel(x_ref, w_ref, out_ref, *, n_layers):
    h = x_ref[...]                                        # (8, 128) f32
    for i in range(n_layers):                             # static Python unroll (L = 3)
        w = w_ref[i, 0:D_PAD, :]                          # (128, 128)  W^T, zero-padded
        b = w_ref[i, D_PAD:D_PAD + 1, :]                  # (1, 128)    bias row of slab
        z = jnp.dot(h, w, preferred_element_type=jnp.float32) + b
        h = jnp.tanh(z)                                   # full-width EUP tanh
    out_ref[...] = h                                      # single unmasked (8,128) store


# ---------------------------------------------------------------------------
# One-time parameter packing (hoisted out of the per-call path; weights are static).
# params: list of (W, b) in PyTorch layout, W: (out_features, in_features), b: (out,)
# ---------------------------------------------------------------------------
def pack_params(params, d_pad=D_PAD):
    n_layers = len(params)
    slab = np.zeros((n_layers, d_pad + 8, d_pad), np.float32)
    for i, (w, b) in enumerate(params):
        w = np.asarray(w, np.float32)                     # (out, in)
        b = np.asarray(b, np.float32)                     # (out,)
        d_out, d_in = w.shape
        slab[i, :d_in, :d_out] = w.T                      # pre-transposed once, here
        slab[i, d_pad, :d_out] = b                        # bias folded into the slab
    return jnp.asarray(slab)


# ---------------------------------------------------------------------------
# Jitted wrapper: pad x, one pallas_call, slice the valid output back out.
# ---------------------------------------------------------------------------
@functools.partial(jax.jit, static_argnames=("out_dim",))
def model_ann_forward(x, slab, *, out_dim):
    x = x.astype(jnp.float32)
    batch, d_in = x.shape
    n_layers = slab.shape[0]

    x_pad = jnp.zeros((B_PAD, D_PAD), jnp.float32).at[:batch, :d_in].set(x)

    vmem = pl.BlockSpec(memory_space=pltpu.MemorySpace.VMEM)
    cost = pl.CostEstimate(
        flops=2 * B_PAD * D_PAD * D_PAD * n_layers,
        transcendentals=B_PAD * D_PAD * n_layers,
        bytes_accessed=4 * (x_pad.size + slab.size + B_PAD * D_PAD),
    )

    out_pad = pl.pallas_call(
        functools.partial(mlp_tanh_kernel, n_layers=n_layers),
        out_shape=jax.ShapeDtypeStruct((B_PAD, D_PAD), jnp.float32),
        in_specs=[vmem, vmem],
        out_specs=vmem,
        cost_estimate=cost,
    )(x_pad, slab)

    return out_pad[:batch, :out_dim]


# ---------------------------------------------------------------------------
# Pure-JAX reference (mirrors the PyTorch module exactly).
# ---------------------------------------------------------------------------
def reference_forward(x, params):
    h = x.astype(jnp.float32)
    for w, b in params:
        h = jnp.tanh(jnp.dot(h, w.T, precision=jax.lax.Precision.HIGHEST) + b)
    return h


# ---------------------------------------------------------------------------
# Deterministic parameter construction (PyTorch nn.Linear-style uniform init).
# ---------------------------------------------------------------------------
def make_params(key, layer_hidden):
    params = []
    for idx in range(len(layer_hidden) - 1):
        fan_in = layer_hidden[idx]
        fan_out = layer_hidden[idx + 1]
        key, kw, kb = jax.random.split(key, 3)
        s = 1.0 / float(np.sqrt(fan_in))
        w = jax.random.uniform(kw, (fan_out, fan_in), jnp.float32, -s, s)
        b = jax.random.uniform(kb, (fan_out,), jnp.float32, -s, s)
        params.append((w, b))
    return params


if __name__ == "__main__":
    # model_ann(input_size=16, output_size=8, layer_size=[32, 32]), batch=2
    B = 2
    input_size, layer_size, output_size = 16, [32, 32], 8
    layer_hidden = [input_size] + list(layer_size) + [output_size]

    key = jax.random.PRNGKey(0)
    kx, kp = jax.random.split(key)
    x = jax.random.normal(kx, (B, input_size), jnp.float32)
    params = make_params(kp, layer_hidden)

    slab = pack_params(params)          # packed / transposed ONCE, outside the hot path

    out = model_ann_forward(x, slab, out_dim=output_size)
    jax.block_until_ready(out)

    ref = reference_forward(x, params)
    assert out.shape == (B, output_size)
    assert jnp.allclose(out, ref, rtol=1e-4, atol=1e-5)

    print("KERNEL_OK")
</pallas_src>

<mosaic_0001>
module attributes {stable_mosaic.version = 11 : i64} {
  func.func @mlp_tanh_kernel(%arg0: memref<8x128xf32, #tpu.memory_space<vmem>>, %arg1: memref<3x136x128xf32, #tpu.memory_space<vmem>>, %arg2: memref<8x128xf32, #tpu.memory_space<vmem>>) attributes {dimension_semantics = [], scalar_prefetch = 0 : i64, scratch_operands = 0 : i64, tpu.core_type = #tpu.core_type<tc>} {
    %c0 = arith.constant 0 : index
    %c0_0 = arith.constant 0 : index
    %0 = vector.load %arg0[%c0, %c0_0] : memref<8x128xf32, #tpu.memory_space<vmem>>, vector<8x128xf32>
    %c0_1 = arith.constant 0 : index
    %c0_2 = arith.constant 0 : index
    %c0_3 = arith.constant 0 : index
    %1 = vector.load %arg1[%c0_1, %c0_2, %c0_3] : memref<3x136x128xf32, #tpu.memory_space<vmem>>, vector<1x128x128xf32>
    %2 = vector.shape_cast %1 : vector<1x128x128xf32> to vector<128x128xf32>
    %c0_4 = arith.constant 0 : index
    %c128 = arith.constant 128 : index
    %c0_5 = arith.constant 0 : index
    %3 = vector.load %arg1[%c0_4, %c128, %c0_5] : memref<3x136x128xf32, #tpu.memory_space<vmem>>, vector<1x1x128xf32>
    %4 = vector.shape_cast %3 : vector<1x1x128xf32> to vector<1x128xf32>
    %cst = arith.constant dense<0.000000e+00> : vector<8x128xf32>
    %5 = tpu.matmul %0, %2, %cst {dimension_numbers = #tpu.dot_dimension_numbers<[1], [0], [0], [1], [0, 0, 1, 1], [], []>} : vector<8x128xf32>, vector<128x128xf32>, vector<8x128xf32> -> vector<8x128xf32>
    %6 = vector.broadcast %4 : vector<1x128xf32> to vector<8x128xf32>
    %7 = arith.addf %5, %6 : vector<8x128xf32>
    %8 = math.tanh %7 : vector<8x128xf32>
    %c1 = arith.constant 1 : index
    %c0_6 = arith.constant 0 : index
    %c0_7 = arith.constant 0 : index
    %9 = vector.load %arg1[%c1, %c0_6, %c0_7] : memref<3x136x128xf32, #tpu.memory_space<vmem>>, vector<1x128x128xf32>
    %10 = vector.shape_cast %9 : vector<1x128x128xf32> to vector<128x128xf32>
    %c1_8 = arith.constant 1 : index
    %c128_9 = arith.constant 128 : index
    %c0_10 = arith.constant 0 : index
    %11 = vector.load %arg1[%c1_8, %c128_9, %c0_10] : memref<3x136x128xf32, #tpu.memory_space<vmem>>, vector<1x1x128xf32>
    %12 = vector.shape_cast %11 : vector<1x1x128xf32> to vector<1x128xf32>
    %cst_11 = arith.constant dense<0.000000e+00> : vector<8x128xf32>
    %13 = tpu.matmul %8, %10, %cst_11 {dimension_numbers = #tpu.dot_dimension_numbers<[1], [0], [0], [1], [0, 0, 1, 1], [], []>} : vector<8x128xf32>, vector<128x128xf32>, vector<8x128xf32> -> vector<8x128xf32>
    %14 = vector.broadcast %12 : vector<1x128xf32> to vector<8x128xf32>
    %15 = arith.addf %13, %14 : vector<8x128xf32>
    %16 = math.tanh %15 : vector<8x128xf32>
    %c2 = arith.constant 2 : index
    %c0_12 = arith.constant 0 : index
    %c0_13 = arith.constant 0 : index
    %17 = vector.load %arg1[%c2, %c0_12, %c0_13] : memref<3x136x128xf32, #tpu.memory_space<vmem>>, vector<1x128x128xf32>
    %18 = vector.shape_cast %17 : vector<1x128x128xf32> to vector<128x128xf32>
    %c2_14 = arith.constant 2 : index
    %c128_15 = arith.constant 128 : index
    %c0_16 = arith.constant 0 : index
    %19 = vector.load %arg1[%c2_14, %c128_15, %c0_16] : memref<3x136x128xf32, #tpu.memory_space<vmem>>, vector<1x1x128xf32>
    %20 = vector.shape_cast %19 : vector<1x1x128xf32> to vector<1x128xf32>
    %cst_17 = arith.constant dense<0.000000e+00> : vector<8x128xf32>
    %21 = tpu.matmul %16, %18, %cst_17 {dimension_numbers = #tpu.dot_dimension_numbers<[1], [0], [0], [1], [0, 0, 1, 1], [], []>} : vector<8x128xf32>, vector<128x128xf32>, vector<8x128xf32> -> vector<8x128xf32>
    %22 = vector.broadcast %20 : vector<1x128xf32> to vector<8x128xf32>
    %23 = arith.addf %21, %22 : vector<8x128xf32>
    %24 = math.tanh %23 : vector<8x128xf32>
    %c0_18 = arith.constant 0 : index
    %c0_19 = arith.constant 0 : index
    %25 = vector.load %arg2[%c0_18, %c0_19] : memref<8x128xf32, #tpu.memory_space<vmem>>, vector<8x128xf32>
    tpu.vector_store %arg2[%c0_18, %c0_19], %24 {strides = array<i32>} : memref<8x128xf32, #tpu.memory_space<vmem>>, vector<8x128xf32>,
    return
  }
}

</mosaic_0001>

<bundles_post_ra>
// kernel: model_ann_forward.1
= control target key start
LH: loop header
LB: loop body
LE: loop exit
PB: predicated region body
PF: predicated region fallthrough
CT: control target
= control target key end

     0   :  { %7 = vsyncpa [#allocation3], 0  ;;  %s502_s9 = smov [#allocation2]   ;;  %s585_s0 = inlined_call_operand.vmem [shape: f32[8,128], index: 0, kind: input, shape index: {}]   ;;  %s586_s1 = inlined_call_operand.hbm [shape: f32[3,136,128], index: 1, kind: input, shape index: {}]   ;;  %s587_s2 = inlined_call_operand.vmem [shape: f32[8,128], index: 2, kind: output, shape index: {}]  }
   0x1   :  { %s15_s10 = sshll.u32 %s502_s9, 4  ;;  %s16_s10 = int_to_ptr.vmem [resolvable:$true] %s15_s10 }
   0x2   :  { %s488_s11 = scalar_lea.vmem %s16_s10, 6528  ;;  %p493_p1 = scmp.lt.s32.totalorder %s16_s10, %s16_s10 }
   0x3   :  { %p489_p0 = scmp.ne.s32.totalorder %s16_s10, %s488_s11  ;;  %p494_p2 = scmp.lt.s32.totalorder %s488_s11, %s488_s11 }
   0x5   :  { %p495_p3 = por %p494_p2, %p493_p1 }
   0x7   :  { %p496_p4 = pnand %p495_p3, %p489_p0 }
   0x9   :  { %499 = shalt.err (!%p496_p4)
}
   0xa   :  { %s503_s12 = smov 128   ;;  %s504_s13 = smov 8  }
   0xb   :  { %21 = dma.hbm_to_vmem [thread:$0]  %s586_s1, 6528, %s16_s10, [#allocation3], %s503_s12, %s503_s12, %s504_s13  }
   0xc   :  { %500 = dma.done.wait [#allocation3], 6528  }
   0xd   :  { %501 = vsyncadd [#allocation3], 4294960768  ;;  %v505_v0 = vmov 0.0   ;;  %vm506_vm0 = vmmov 0   ;;  %v41_v1 = vld [vmem:[#allocation2 + $0x78] sm:$0xff]  ;;  %v40_v2 = vld [vmem:[#allocation2 + $0x70] sm:$0xff] }
   0xe   :  { %364 = vmatprep.subr.mxu0 %v505_v0  ;;  %396 = vmatprep.mubr.msk.f32.mxu0 %vm506_vm0, %v505_v0  ;;  %v39_v3 = vld [vmem:[#allocation2 + $0x68] sm:$0xff]  ;;  %v38_v4 = vld [vmem:[#allocation2 + $0x60] sm:$0xff]  ;;  %v37_v6 = vld [vmem:[#allocation2 + $0x58] sm:$0xff] }
   0xf   :  { %399 = vmatprep.subr.mxu1 %v505_v0  ;;  %431 = vmatprep.mubr.msk.f32.mxu1 %vm506_vm0, %v505_v0  ;;  %v134_v5 = vld [vmem:[#allocation2 + $0x100] sm:$0xff]  ;;  %v133_v7 = vld [vmem:[#allocation2 + $0xf8] sm:$0xff]  ;;  %v132_v8 = vld [vmem:[#allocation2 + $0xf0] sm:$0xff] }
  0x10   :  { %365 = vmatpush3.msra.mxu0 %v41_v1  ;;  %400 = vmatpush3.msra.mxu1 %v134_v5  ;;  %v36_v9 = vld [vmem:[#allocation2 + $0x50] sm:$0xff]  ;;  %v131_v10 = vld [vmem:[#allocation2 + $0xe8] sm:$0xff]  ;;  %v130_v12 = vld [vmem:[#allocation2 + $0xe0] sm:$0xff] }
  0x11   :  { %366 = vmatprep.subr.mxu0 %v505_v0  ;;  %401 = vmatprep.subr.mxu1 %v505_v0  ;;  %v35_v11 = vld [vmem:[#allocation2 + $0x48] sm:$0xff]  ;;  %v34_v13 = vld [vmem:[#allocation2 + $0x40] sm:$0xff]  ;;  %v129_v14 = vld [vmem:[#allocation2 + $0xd8] sm:$0xff] }
  0x12   :  { %367 = vmatpush3.msra.mxu0 %v40_v2  ;;  %402 = vmatpush3.msra.mxu1 %v133_v7  ;;  %v33_v15 = vld [vmem:[#allocation2 + $0x38] sm:$0xff]  ;;  %v128_v16 = vld [vmem:[#allocation2 + $0xd0] sm:$0xff]  ;;  %v31_v18 = vld [vmem:[#allocation2 + $0x28] sm:$0xff] }
  0x13   :  { %368 = vmatprep.subr.mxu0 %v505_v0  ;;  %403 = vmatprep.subr.mxu1 %v505_v0  ;;  %v32_v17 = vld [vmem:[#allocation2 + $0x30] sm:$0xff]  ;;  %v30_v19 = vld [vmem:[#allocation2 + $0x20] sm:$0xff]  ;;  %v29_v20 = vld [vmem:[#allocation2 + $0x18] sm:$0xff] }
  0x14   :  { %369 = vmatpush3.msra.mxu0 %v39_v3  ;;  %404 = vmatpush3.msra.mxu1 %v132_v8  ;;  %v28_v21 = vld [vmem:[#allocation2 + $0x10] sm:$0xff]  ;;  %v27_v22 = vld [vmem:[#allocation2 + $0x8] sm:$0xff]  ;;  %v26_v23 = vld [vmem:[#allocation2] sm:$0xff] }
  0x15   :  { %370 = vmatprep.subr.mxu0 %v505_v0  ;;  %405 = vmatprep.subr.mxu1 %v505_v0  ;;  %v25_v24 = vld [vmem:[%s585_s0] sm:$0xff]  ;;  %v127_v25 = vld [vmem:[#allocation2 + $0xc8] sm:$0xff]  ;;  %v125_v27 = vld [vmem:[#allocation2 + $0xb8] sm:$0xff] }
  0x16   :  { %371 = vmatpush3.msra.mxu0 %v38_v4  ;;  %406 = vmatpush3.msra.mxu1 %v131_v10  ;;  %v126_v26 = vld [vmem:[#allocation2 + $0xc0] sm:$0xff]  ;;  %v124_v28 = vld [vmem:[#allocation2 + $0xb0] sm:$0xff]  ;;  %v123_v29 = vld [vmem:[#allocation2 + $0xa8] sm:$0xff] }
  0x17   :  { %372 = vmatprep.subr.mxu0 %v505_v0  ;;  %407 = vmatprep.subr.mxu1 %v505_v0  ;;  %v122_v30 = vld [vmem:[#allocation2 + $0xa0] sm:$0xff]  ;;  %v121_v31 = vld [vmem:[#allocation2 + $0x98] sm:$0xff]  ;;  %v120_v32 = vld [vmem:[#allocation2 + $0x90] sm:$0xff] }
  0x18   :  { %373 = vmatpush3.msra.mxu0 %v37_v6  ;;  %408 = vmatpush3.msra.mxu1 %v130_v12  ;;  %v119_v33 = vld [vmem:[#allocation2 + $0x88] sm:$0xff]  ;;  %v226_v35 = vld [vmem:[#allocation2 + $0x180] sm:$0xff]  ;;  %v225_v36 = vld [vmem:[#allocation2 + $0x178] sm:$0xff] }
  0x19   :  { %374 = vmatprep.subr.mxu0 %v505_v0  ;;  %409 = vmatprep.subr.mxu1 %v505_v0  ;;  %v227_v34 = vld [vmem:[#allocation2 + $0x188] sm:$0xff]  ;;  %v224_v37 = vld [vmem:[#allocation2 + $0x170] sm:$0xff]  ;;  %v222_v39 = vld [vmem:[#allocation2 + $0x160] sm:$0xff] }
  0x1a   :  { %375 = vmatpush3.msra.mxu0 %v36_v9  ;;  %410 = vmatpush3.msra.mxu1 %v129_v14  ;;  %v223_v38 = vld [vmem:[#allocation2 + $0x168] sm:$0xff]  ;;  %v221_v40 = vld [vmem:[#allocation2 + $0x158] sm:$0xff]  ;;  %v310_v41 = vld [vmem:[#allocation2 + $0x80] ss:$0 sm:$0xff] }
  0x1b   :  { %376 = vmatprep.subr.mxu0 %v505_v0  ;;  %411 = vmatprep.subr.mxu1 %v505_v0  ;;  %v220_v46 = vld [vmem:[#allocation2 + $0x150] sm:$0xff]  ;;  %v219_v47 = vld [vmem:[#allocation2 + $0x148] sm:$0xff]  ;;  %v218_v48 = vld [vmem:[#allocation2 + $0x140] sm:$0xff] }
  0x1c   :  { %377 = vmatpush3.msra.mxu0 %v35_v11  ;;  %412 = vmatpush3.msra.mxu1 %v128_v16  ;;  %v217_v49 = vld [vmem:[#allocation2 + $0x138] sm:$0xff]  ;;  %v216_v50 = vld [vmem:[#allocation2 + $0x130] sm:$0xff]  ;;  %v215_v51 = vld [vmem:[#allocation2 + $0x128] sm:$0xff] }
  0x1d   :  { %378 = vmatprep.subr.mxu0 %v505_v0  ;;  %413 = vmatprep.subr.mxu1 %v505_v0  ;;  %v214_v52 = vld [vmem:[#allocation2 + $0x120] sm:$0xff]  ;;  %v213_v53 = vld [vmem:[#allocation2 + $0x118] sm:$0xff]  ;;  %v212_v54 = vld [vmem:[#allocation2 + $0x110] sm:$0xff] }
  0x1e   :  { %379 = vmatpush3.msra.mxu0 %v34_v13  ;;  %414 = vmatpush3.msra.mxu1 %v127_v25  ;;  %v311_v55 = vld [vmem:[#allocation2 + $0x108] ss:$0 sm:$0xff]  ;;  %v312_v60 = vld [vmem:[#allocation2 + $0x190] ss:$0 sm:$0xff] }
  0x1f   :  { %380 = vmatprep.subr.mxu0 %v505_v0  ;;  %415 = vmatprep.subr.mxu1 %v505_v0 }
  0x20   :  { %381 = vmatpush3.msra.mxu0 %v33_v15  ;;  %416 = vmatpush3.msra.mxu1 %v126_v26 }
  0x21   :  { %382 = vmatprep.subr.mxu0 %v505_v0  ;;  %417 = vmatprep.subr.mxu1 %v505_v0 }
  0x22   :  { %383 = vmatpush3.msra.mxu0 %v32_v17  ;;  %418 = vmatpush3.msra.mxu1 %v125_v27 }
  0x23   :  { %384 = vmatprep.subr.mxu0 %v505_v0  ;;  %419 = vmatprep.subr.mxu1 %v505_v0 }
  0x24   :  { %385 = vmatpush3.msra.mxu0 %v31_v18  ;;  %420 = vmatpush3.msra.mxu1 %v124_v28 }
  0x25   :  { %386 = vmatprep.subr.mxu0 %v505_v0  ;;  %421 = vmatprep.subr.mxu1 %v505_v0 }
  0x26   :  { %387 = vmatpush3.msra.mxu0 %v30_v19  ;;  %422 = vmatpush3.msra.mxu1 %v123_v29 }
  0x27   :  { %388 = vmatprep.subr.mxu0 %v505_v0  ;;  %423 = vmatprep.subr.mxu1 %v505_v0 }
  0x28   :  { %389 = vmatpush3.msra.mxu0 %v29_v20  ;;  %424 = vmatpush3.msra.mxu1 %v122_v30 }
  0x29   :  { %390 = vmatprep.subr.mxu0 %v505_v0  ;;  %425 = vmatprep.subr.mxu1 %v505_v0 }
  0x2a   :  { %391 = vmatpush3.msra.mxu0 %v28_v21  ;;  %426 = vmatpush3.msra.mxu1 %v121_v31 }
  0x2b   :  { %392 = vmatprep.subr.mxu0 %v505_v0  ;;  %427 = vmatprep.subr.mxu1 %v505_v0 }
  0x2c   :  { %393 = vmatpush3.msra.mxu0 %v27_v22  ;;  %428 = vmatpush3.msra.mxu1 %v120_v32 }
  0x2d   :  { %394 = vmatprep.subr.mxu0 %v505_v0  ;;  %429 = vmatprep.subr.mxu1 %v505_v0 }
  0x2e   :  { %395 = vmatpush3.msra.mxu0 %v26_v23  ;;  %430 = vmatpush3.msra.mxu1 %v119_v33 }
  0x2f   :  { %397 = vmatmul.mubr.f32.vlgmr.msra.gmra.mxu0 %v25_v24  ;;  %434 = vmatprep.subr.mxu0 %v505_v0 }
  0x30   :  { %466 = vmatprep.mubr.msk.f32.mxu0 %vm506_vm0, %v505_v0  ;;  %435 = vmatpush3.msra.mxu0 %v227_v34 }
  0x31   :  { %436 = vmatprep.subr.mxu0 %v505_v0 }
  0x32   :  { %437 = vmatpush3.msra.mxu0 %v226_v35 }
  0x33   :  { %438 = vmatprep.subr.mxu0 %v505_v0 }
  0x34   :  { %439 = vmatpush3.msra.mxu0 %v225_v36 }
  0x35   :  { %440 = vmatprep.subr.mxu0 %v505_v0 }
  0x36   :  { %441 = vmatpush3.msra.mxu0 %v224_v37 }
  0x37   :  { %442 = vmatprep.subr.mxu0 %v505_v0 }
  0x38   :  { %443 = vmatpush3.msra.mxu0 %v223_v38 }
  0x39   :  { %444 = vmatprep.subr.mxu0 %v505_v0 }
  0x3a   :  { %445 = vmatpush3.msra.mxu0 %v222_v39 }
  0x3b   :  { %446 = vmatprep.subr.mxu0 %v505_v0 }
  0x3c   :  { %447 = vmatpush3.msra.mxu0 %v221_v40 }
  0x3d   :  { %448 = vmatprep.subr.mxu0 %v505_v0 }
  0x3e   :  { %449 = vmatpush3.msra.mxu0 %v220_v46 }
  0x3f   :  { %450 = vmatprep.subr.mxu0 %v505_v0 }
  0x40   :  { %451 = vmatpush3.msra.mxu0 %v219_v47 }
  0x41   :  { %452 = vmatprep.subr.mxu0 %v505_v0 }
  0x42   :  { %453 = vmatpush3.msra.mxu0 %v218_v48 }
  0x43   :  { %454 = vmatprep.subr.mxu0 %v505_v0 }
  0x44   :  { %455 = vmatpush3.msra.mxu0 %v217_v49 }
  0x45   :  { %456 = vmatprep.subr.mxu0 %v505_v0 }
  0x46   :  { %457 = vmatpush3.msra.mxu0 %v216_v50 }
  0x47   :  { %458 = vmatprep.subr.mxu0 %v505_v0 }
  0x48   :  { %459 = vmatpush3.msra.mxu0 %v215_v51 }
  0x49   :  { %460 = vmatprep.subr.mxu0 %v505_v0 }
  0x4a   :  { %461 = vmatpush3.msra.mxu0 %v214_v52 }
  0x4b   :  { %462 = vmatprep.subr.mxu0 %v505_v0 }
  0x4c   :  { %463 = vmatpush3.msra.mxu0 %v213_v53 }
  0x4d   :  { %464 = vmatprep.subr.mxu0 %v505_v0 }
  0x4e   :  { %465 = vmatpush3.msra.mxu0 %v212_v54 }
  0xef   :  { %v113_v42 = vpop.f32.mrf.mxu0 }
  0xf0   :  { %v114_v43 = vadd.f32 %v310_v41, %v113_v42 }
  0xf1   :  { %v398_v44 = vpop.f32.mrf.mxu0 }
  0xf2   :  { %474 = vtanh.f32 %v114_v43 }
  0xff   :  { %v475_v45 = vpop.eup %474 }
 0x100   :  { %432 = vmatmul.mubr.f32.vlgmr.msra.gmra.mxu1 %v475_v45 }
 0x1c0   :  { %v206_v56 = vpop.f32.mrf.mxu1 }
 0x1c1   :  { %v207_v57 = vadd.f32 %v311_v55, %v206_v56 }
 0x1c2   :  { %v433_v58 = vpop.f32.mrf.mxu1 }
 0x1c3   :  { %476 = vtanh.f32 %v207_v57 }
 0x1d0   :  { %v477_v59 = vpop.eup %476 }
 0x1d1   :  { %467 = vmatmul.mubr.f32.vlgmr.msra.gmra.mxu0 %v477_v59 }
 0x291   :  { %v299_v61 = vpop.f32.mrf.mxu0 }
 0x292   :  { %v300_v62 = vadd.f32 %v312_v60, %v299_v61 }
 0x293   :  { %v468_v63 = vpop.f32.mrf.mxu0 }
 0x294   :  { %478 = vtanh.f32 %v300_v62 }
 0x2a1   :  { %v479_v1 = vpop.eup %478 }
 0x2a2   :  { %304 = vst [vmem:[%s587_s2] sm:$0xff] %v479_v1 }
 0x2a3   :  { %309 = vsyncpa [#allocation3], 1 }

</bundles_post_ra>
